<compile_context>
chip_gen: v5e
topology: v5e:2x2
jax: 0.10.0
libtpu: 0.0.40
codegen_flags: <defaults>
</compile_context>

<pallas_src>
import jax
import jax.numpy as jnp
from jax.experimental import pallas as pl
from jax.experimental.pallas import tpu as pltpu


def _identity_kernel(x_ref, o_ref):
    # Pure pass-through: load the tile and store it to the output tile.
    o_ref[...] = x_ref[...]


def _min_sublane(dtype):
    itemsize = jnp.dtype(dtype).itemsize
    if itemsize >= 4:
        return 8
    if itemsize == 2:
        return 16
    return 32


def _choose_layout(shape, dtype):
    """Pick a lane-dense 2D view (rows, cols) and a row-tile size."""
    total = 1
    for d in shape:
        total *= int(d)
    itemsize = jnp.dtype(dtype).itemsize

    # Prefer a trailing dim that is a large multiple of 128 (unmasked,
    # lane-dense vector stores -- the biggest single BlockSpec lever for a
    # memcpy-style kernel).
    cols = None
    for cand in (4096, 2048, 1024, 512, 256, 128):
        if total % cand == 0:
            cols = cand
            break
    if cols is None:
        # Awkward (non-128-divisible) element counts: a full-extent last dim
        # is exempt from the (8,128) rule and keeps stores lane-dense.  Only
        # do this when the whole array fits as a single modest VMEM block.
        if total * itemsize <= 4 * 1024 * 1024:
            return 1, total, 1
        # Very large + awkward count: fall back to the natural trailing dim
        # (correct; may use masked partial stores on the last lane group).
        # TODO(synk): split into a 128-aligned main body plus a tiny tail to
        # keep stores unmasked for huge non-128-divisible inputs.
        cols = int(shape[-1]) if len(shape) >= 1 else 1
    rows = total // cols

    # Row tile: dtype-aware sublane multiple, sized for ~2 MiB blocks so
    # double-buffered in+out (~4x block bytes) fits comfortably in scoped
    # VMEM on every generation (v5e 16 MiB scoped default, v7x 64 MiB phys).
    sub = _min_sublane(dtype)
    target_bytes = 2 * 1024 * 1024
    tile_rows = (target_bytes // max(1, cols * itemsize)) // sub * sub
    tile_rows = max(sub, tile_rows)
    if tile_rows >= rows:
        # Single block covering the whole (small) array -- always legal since
        # block dims equal to the full array dims are exempt from (8, 128).
        tile_rows = rows
    return rows, cols, tile_rows


def print_layer(x, *, use_kernel=False, donate=False):
    """Pallas equivalent of PrintLayer.forward: print shape, return x.

    Default is the optimized path (no kernel): the module does zero compute,
    so the fastest correct implementation on every TPU generation is to
    return x directly.  `use_kernel=True` routes through an identity Pallas
    kernel for API parity / testing.  `donate=True` additionally requests
    output aliasing onto the input buffer (only do this when the caller
    actually donates x, e.g. via jit donate_argnums).
    """
    print(tuple(x.shape))

    if not use_kernel or x.size == 0:
        # Hot path: identity -- skip the pallas_call entirely.
        return x

    orig_shape = x.shape
    rows, cols, tile_rows = _choose_layout(orig_shape, x.dtype)
    x2 = x.reshape(rows, cols)

    grid = (pl.cdiv(rows, tile_rows),)

    io_aliases = {0: 0} if donate else {}

    out2 = pl.pallas_call(
        _identity_kernel,
        out_shape=jax.ShapeDtypeStruct((rows, cols), x2.dtype),
        grid=grid,
        in_specs=[pl.BlockSpec((tile_rows, cols), lambda i: (i, 0))],
        out_specs=pl.BlockSpec((tile_rows, cols), lambda i: (i, 0)),
        input_output_aliases=io_aliases,
        cost_estimate=pl.CostEstimate(
            flops=0,
            transcendentals=0,
            bytes_accessed=2 * x.size * jnp.dtype(x.dtype).itemsize,
        ),
        compiler_params=pltpu.CompilerParams(
            dimension_semantics=("parallel",),
        ),
    )(x2)

    return out2.reshape(orig_shape)


if __name__ == "__main__":
    key = jax.random.PRNGKey(0)
    # Small NCHW input consistent with a conv-style pipeline: batch=2,
    # channels=4, spatial=16x16.
    x = jax.random.normal(key, (2, 4, 16, 16), dtype=jnp.float32)

    # Default (optimized) path: pure pass-through, no kernel launch.
    y_fast = print_layer(x)
    assert y_fast.shape == x.shape and y_fast.dtype == x.dtype

    # Kernel path (API parity / testing): exercises the Pallas identity copy.
    y = print_layer(x, use_kernel=True)
    y = jax.block_until_ready(y)

    assert y.shape == x.shape
    assert y.dtype == x.dtype
    assert bool(jnp.array_equal(y, x))
    assert bool(jnp.array_equal(y_fast, x))

    print("KERNEL_OK")
</pallas_src>

<mosaic_0001>
module attributes {stable_mosaic.version = 11 : i64} {
  func.func @_identity_kernel(%arg0: i32, %arg1: memref<1x2048xf32, #tpu.memory_space<vmem>>, %arg2: memref<1x2048xf32, #tpu.memory_space<vmem>>) attributes {dimension_semantics = [#tpu.dimension_semantics<parallel>], iteration_bounds = array<i64: 1>, scalar_prefetch = 0 : i64, scratch_operands = 0 : i64, tpu.core_type = #tpu.core_type<tc>, window_params = [{transform_indices = @transform_0, window_bounds = array<i64: 1, 2048>}, {transform_indices = @transform_1, window_bounds = array<i64: 1, 2048>}]} {
    %c0 = arith.constant 0 : index
    %c0_0 = arith.constant 0 : index
    %0 = vector.load %arg1[%c0, %c0_0] : memref<1x2048xf32, #tpu.memory_space<vmem>>, vector<1x2048xf32>
    %c0_1 = arith.constant 0 : index
    %c0_2 = arith.constant 0 : index
    %1 = vector.load %arg2[%c0_1, %c0_2] : memref<1x2048xf32, #tpu.memory_space<vmem>>, vector<1x2048xf32>
    tpu.vector_store %arg2[%c0_1, %c0_2], %0 {strides = array<i32>} : memref<1x2048xf32, #tpu.memory_space<vmem>>, vector<1x2048xf32>,
    return
  }
  func.func @transform_0(%arg0: i32) -> (i32, i32) {
    %c0_i32 = arith.constant 0 : i32
    %c0_i32_0 = arith.constant 0 : i32
    return %arg0, %c0_i32 : i32, i32
  }
  func.func @transform_1(%arg0: i32) -> (i32, i32) {
    %c0_i32 = arith.constant 0 : i32
    %c0_i32_0 = arith.constant 0 : i32
    return %arg0, %c0_i32 : i32, i32
  }
}

</mosaic_0001>

<bundles_post_ra>
// kernel: tpu_custom_call.1
= control target key start
LH: loop header
LB: loop body
LE: loop exit
PB: predicated region body
PF: predicated region fallthrough
CT: control target
= control target key end

     0   :  { %6 = vsyncpa [#allocation3], 0  ;;  %s116_s0 = inlined_call_operand.hbm [shape: f32[1,2048], index: 0, kind: input, shape index: {}]   ;;  %s117_s1 = inlined_call_operand.hbm [shape: f32[1,2048], index: 1, kind: output, shape index: {}]  }
   0x1   :  { %7 = vsyncpa [#allocation4], 0  ;;  %s13_s8 = sshll.u32 %s116_s0, 4  ;;  %s98_s9 = smov [#allocation2]   ;;  %s14_s8 = int_to_ptr.hbm [resolvable:$true] %s13_s8 }
   0x2   :  { %s15_s10 = sshll.u32 %s98_s9, 4  ;;  %s16_s10 = int_to_ptr.vmem [resolvable:$true] %s15_s10 }
   0x3   :  { %18 = dma.hbm_to_vmem [thread:$0]  %s14_s8, 256, %s16_s10, [#allocation3]  }
   0x4   :  { %94 = dma.done.wait [#allocation3], 256  }
   0x5   :  { %95 = vsyncadd [#allocation3], 4294967040  ;;  %s99_s11 = smov [#allocation5]   ;;  %s34_s15 = sshll.u32 %s117_s1, 4  ;;  %v23_v0 = vld [vmem:[#allocation2] sm:$0xff]  ;;  %v24_v1 = vld [vmem:[#allocation2 + $0x8] sm:$0xff]  ;;  %s35_s15 = int_to_ptr.hbm [resolvable:$true] %s34_s15 }
   0x6   :  { %s32_s12 = sshll.u32 %s99_s11, 4  ;;  %25 = vst [vmem:[#allocation5] sm:$0xff] %v23_v0  ;;  %s33_s12 = int_to_ptr.vmem [resolvable:$true] %s32_s12 }
   0x7   :  { %26 = vst [vmem:[#allocation5 + $0x8] sm:$0xff] %v24_v1 }
   0x8   :  { %37 = dma.vmem_to_hbm [thread:$0]  %s33_s12, 256, %s35_s15, [#allocation4]  }
   0x9   :  { %96 = dma.done.wait [#allocation4], 256  }
   0xa   :  { %97 = vsyncadd [#allocation4], 4294967040 }
   0xb   :  { %42 = vsyncpa [#allocation3], 1 }
   0xc   :  { %43 = vsyncpa [#allocation4], 1 }

</bundles_post_ra>
